<compile_context>
chip_gen: v6e
topology: v6e:2x2x1
jax: 0.10.0
libtpu: 0.0.40
codegen_flags: <defaults>
</compile_context>

<pallas_src>
import jax
import jax.numpy as jnp
from jax.experimental import pallas as pl
from jax.experimental.pallas import tpu as pltpu

IN_FEATURES = 13
IN_PAD = 16           # pad feature dim to a bf16-sublane-friendly size (zeros -> no effect)
TILE_B = 512          # batch tile (multiple of 128 -> lane-dense, multiple of 16 for bf16)


def _mlp_kernel(x_ref, w1_ref, b1_ref, w2_ref, b2_ref, w3_ref, b3_ref,
                w4_ref, b4_ref, o_ref):
    xT = x_ref[...]                                                    # (IN_PAD, TILE_B) bf16
    # Layer 1: Linear(13, 64) + ReLU   (Dropout is identity at inference)
    h = jnp.dot(w1_ref[...], xT, preferred_element_type=jnp.float32)   # (64, TILE_B) f32 acc
    h = jnp.maximum(h + b1_ref[...], 0.0)
    # Layer 2: Linear(64, 32) + ReLU   (Dropout is identity at inference)
    h = jnp.dot(w2_ref[...], h.astype(jnp.bfloat16),
                preferred_element_type=jnp.float32)                    # (32, TILE_B)
    h = jnp.maximum(h + b2_ref[...], 0.0)
    # Layer 3: Linear(32, 16) + ReLU
    h = jnp.dot(w3_ref[...], h.astype(jnp.bfloat16),
                preferred_element_type=jnp.float32)                    # (16, TILE_B)
    h = jnp.maximum(h + b3_ref[...], 0.0)
    # Layer 4: Linear(16, 1) + Sigmoid -- VPU mul + sublane reduce (skip an N=1 MXU pass)
    logits = jnp.sum(w4_ref[...] * h, axis=0, keepdims=True) + b4_ref[...]   # (1, TILE_B)
    o_ref[...] = jax.nn.sigmoid(logits).astype(o_ref.dtype)


def heart_disease_forward(x, params, tile_b=TILE_B):
    """x: (B, 13) float32. params: PyTorch-layout weights w{i}:(out,in), b{i}:(out,)."""
    B = x.shape[0]
    n_tiles = pl.cdiv(B, tile_b)
    B_pad = n_tiles * tile_b

    # --- layout plumbing (wrapper-side): transpose, pad, cast ---
    xT = jnp.zeros((IN_PAD, B_pad), jnp.bfloat16)
    xT = xT.at[:IN_FEATURES, :B].set(x.astype(jnp.bfloat16).T)

    w1 = jnp.zeros((64, IN_PAD), jnp.bfloat16)
    w1 = w1.at[:, :IN_FEATURES].set(params["w1"].astype(jnp.bfloat16))       # (64, 16)
    w2 = params["w2"].astype(jnp.bfloat16)                                   # (32, 64)
    w3 = params["w3"].astype(jnp.bfloat16)                                   # (16, 32)
    w4 = params["w4"].reshape(IN_FEATURES + 3 - 15, -1).T.astype(jnp.float32)  # (16, 1)
    b1 = params["b1"].reshape(-1, 1).astype(jnp.float32)                     # (64, 1)
    b2 = params["b2"].reshape(-1, 1).astype(jnp.float32)                     # (32, 1)
    b3 = params["b3"].reshape(-1, 1).astype(jnp.float32)                     # (16, 1)
    b4 = params["b4"].reshape(1, 1).astype(jnp.float32)                      # (1, 1)

    def const_spec(shape):
        # constant block index: parameter stays resident in VMEM across grid steps
        return pl.BlockSpec(shape, lambda i: (0, 0))

    out_t = pl.pallas_call(
        _mlp_kernel,
        out_shape=jax.ShapeDtypeStruct((1, B_pad), jnp.float32),
        grid=(n_tiles,),
        in_specs=[
            pl.BlockSpec((IN_PAD, tile_b), lambda i: (0, i)),   # x^T tile streams in
            const_spec((64, IN_PAD)), const_spec((64, 1)),
            const_spec((32, 64)),     const_spec((32, 1)),
            const_spec((16, 32)),     const_spec((16, 1)),
            const_spec((16, 1)),      const_spec((1, 1)),
        ],
        out_specs=pl.BlockSpec((1, tile_b), lambda i: (0, i)),  # lane-dense output tile
        compiler_params=pltpu.CompilerParams(
            dimension_semantics=("parallel",),
            vmem_limit_bytes=32 * 1024 * 1024,
        ),
    )(xT, w1, b1, w2, b2, w3, b3, w4, b4)

    # back to PyTorch layout: (B, 1) float32
    return out_t[:, :B].T


def init_params(key):
    """PyTorch nn.Linear default init: U(-1/sqrt(fan_in), 1/sqrt(fan_in)); (out,in) weights."""
    dims = [(13, 64), (64, 32), (32, 16), (16, 1)]
    params = {}
    for i, (fan_in, fan_out) in enumerate(dims, start=1):
        key, kw, kb = jax.random.split(key, 3)
        bound = 1.0 / jnp.sqrt(float(fan_in))
        params[f"w{i}"] = jax.random.uniform(
            kw, (fan_out, fan_in), jnp.float32, minval=-bound, maxval=bound)
        params[f"b{i}"] = jax.random.uniform(
            kb, (fan_out,), jnp.float32, minval=-bound, maxval=bound)
    return params


def reference_forward(x, params):
    h = jnp.maximum(x @ params["w1"].T + params["b1"], 0.0)
    h = jnp.maximum(h @ params["w2"].T + params["b2"], 0.0)
    h = jnp.maximum(h @ params["w3"].T + params["b3"], 0.0)
    return jax.nn.sigmoid(h @ params["w4"].T + params["b4"])


# TODO(synk): training-mode Dropout(0.5) not implemented (inference/predict semantics only).

if __name__ == "__main__":
    key = jax.random.PRNGKey(0)
    key, kx = jax.random.split(key)
    batch = 8
    x = jax.random.normal(kx, (batch, IN_FEATURES), dtype=jnp.float32)
    params = init_params(key)

    out = heart_disease_forward(x, params)
    out = jax.block_until_ready(out)

    ref = reference_forward(x, params)
    assert out.shape == (batch, 1)
    max_err = float(jnp.max(jnp.abs(out - ref)))
    assert max_err < 3e-2, f"mismatch vs reference (max abs err {max_err})"
    print("KERNEL_OK")
</pallas_src>

<mosaic_0001>
module attributes {stable_mosaic.version = 11 : i64} {
  func.func @_mlp_kernel(%arg0: i32, %arg1: memref<16x512xbf16, #tpu.memory_space<vmem>>, %arg2: memref<64x16xbf16, #tpu.memory_space<vmem>>, %arg3: memref<64x1xf32, #tpu.memory_space<vmem>>, %arg4: memref<32x64xbf16, #tpu.memory_space<vmem>>, %arg5: memref<32x1xf32, #tpu.memory_space<vmem>>, %arg6: memref<16x32xbf16, #tpu.memory_space<vmem>>, %arg7: memref<16x1xf32, #tpu.memory_space<vmem>>, %arg8: memref<16x1xf32, #tpu.memory_space<vmem>>, %arg9: memref<1x1xf32, #tpu.memory_space<vmem>>, %arg10: memref<1x512xf32, #tpu.memory_space<vmem>>) attributes {dimension_semantics = [#tpu.dimension_semantics<parallel>], iteration_bounds = array<i64: 1>, scalar_prefetch = 0 : i64, scratch_operands = 0 : i64, tpu.core_type = #tpu.core_type<tc>, window_params = [{transform_indices = @transform_0, window_bounds = array<i64: 16, 512>}, {pipeline_mode = #tpu.pipeline_mode<synchronous>, transform_indices = @transform_1, window_bounds = array<i64: 64, 16>}, {pipeline_mode = #tpu.pipeline_mode<synchronous>, transform_indices = @transform_2, window_bounds = array<i64: 64, 1>}, {pipeline_mode = #tpu.pipeline_mode<synchronous>, transform_indices = @transform_3, window_bounds = array<i64: 32, 64>}, {pipeline_mode = #tpu.pipeline_mode<synchronous>, transform_indices = @transform_4, window_bounds = array<i64: 32, 1>}, {pipeline_mode = #tpu.pipeline_mode<synchronous>, transform_indices = @transform_5, window_bounds = array<i64: 16, 32>}, {pipeline_mode = #tpu.pipeline_mode<synchronous>, transform_indices = @transform_6, window_bounds = array<i64: 16, 1>}, {pipeline_mode = #tpu.pipeline_mode<synchronous>, transform_indices = @transform_7, window_bounds = array<i64: 16, 1>}, {pipeline_mode = #tpu.pipeline_mode<synchronous>, transform_indices = @transform_8, window_bounds = array<i64: 1, 1>}, {transform_indices = @transform_9, window_bounds = array<i64: 1, 512>}]} {
    %c0 = arith.constant 0 : index
    %c0_0 = arith.constant 0 : index
    %0 = vector.load %arg1[%c0, %c0_0] : memref<16x512xbf16, #tpu.memory_space<vmem>>, vector<16x512xbf16>
    %c0_1 = arith.constant 0 : index
    %c0_2 = arith.constant 0 : index
    %1 = vector.load %arg2[%c0_1, %c0_2] : memref<64x16xbf16, #tpu.memory_space<vmem>>, vector<64x16xbf16>
    %cst = arith.constant dense<0.000000e+00> : vector<64x512xf32>
    %2 = tpu.matmul %1, %0, %cst {dimension_numbers = #tpu.dot_dimension_numbers<[1], [0], [0], [1], [0, 0, 1, 1], [], []>} : vector<64x16xbf16>, vector<16x512xbf16>, vector<64x512xf32> -> vector<64x512xf32>
    %c0_3 = arith.constant 0 : index
    %c0_4 = arith.constant 0 : index
    %3 = vector.load %arg3[%c0_3, %c0_4] : memref<64x1xf32, #tpu.memory_space<vmem>>, vector<64x1xf32>
    %4 = vector.broadcast %3 : vector<64x1xf32> to vector<64x512xf32>
    %5 = arith.addf %2, %4 : vector<64x512xf32>
    %cst_5 = arith.constant 0.000000e+00 : f32
    %6 = vector.broadcast %cst_5 : f32 to vector<64x512xf32>
    %7 = arith.maximumf %5, %6 : vector<64x512xf32>
    %c0_6 = arith.constant 0 : index
    %c0_7 = arith.constant 0 : index
    %8 = vector.load %arg4[%c0_6, %c0_7] : memref<32x64xbf16, #tpu.memory_space<vmem>>, vector<32x64xbf16>
    %9 = arith.truncf %7 : vector<64x512xf32> to vector<64x512xbf16>
    %cst_8 = arith.constant dense<0.000000e+00> : vector<32x512xf32>
    %10 = tpu.matmul %8, %9, %cst_8 {dimension_numbers = #tpu.dot_dimension_numbers<[1], [0], [0], [1], [0, 0, 1, 1], [], []>} : vector<32x64xbf16>, vector<64x512xbf16>, vector<32x512xf32> -> vector<32x512xf32>
    %c0_9 = arith.constant 0 : index
    %c0_10 = arith.constant 0 : index
    %11 = vector.load %arg5[%c0_9, %c0_10] : memref<32x1xf32, #tpu.memory_space<vmem>>, vector<32x1xf32>
    %12 = vector.broadcast %11 : vector<32x1xf32> to vector<32x512xf32>
    %13 = arith.addf %10, %12 : vector<32x512xf32>
    %cst_11 = arith.constant 0.000000e+00 : f32
    %14 = vector.broadcast %cst_11 : f32 to vector<32x512xf32>
    %15 = arith.maximumf %13, %14 : vector<32x512xf32>
    %c0_12 = arith.constant 0 : index
    %c0_13 = arith.constant 0 : index
    %16 = vector.load %arg6[%c0_12, %c0_13] : memref<16x32xbf16, #tpu.memory_space<vmem>>, vector<16x32xbf16>
    %17 = arith.truncf %15 : vector<32x512xf32> to vector<32x512xbf16>
    %cst_14 = arith.constant dense<0.000000e+00> : vector<16x512xf32>
    %18 = tpu.matmul %16, %17, %cst_14 {dimension_numbers = #tpu.dot_dimension_numbers<[1], [0], [0], [1], [0, 0, 1, 1], [], []>} : vector<16x32xbf16>, vector<32x512xbf16>, vector<16x512xf32> -> vector<16x512xf32>
    %c0_15 = arith.constant 0 : index
    %c0_16 = arith.constant 0 : index
    %19 = vector.load %arg7[%c0_15, %c0_16] : memref<16x1xf32, #tpu.memory_space<vmem>>, vector<16x1xf32>
    %20 = vector.broadcast %19 : vector<16x1xf32> to vector<16x512xf32>
    %21 = arith.addf %18, %20 : vector<16x512xf32>
    %cst_17 = arith.constant 0.000000e+00 : f32
    %22 = vector.broadcast %cst_17 : f32 to vector<16x512xf32>
    %23 = arith.maximumf %21, %22 : vector<16x512xf32>
    %c0_18 = arith.constant 0 : index
    %c0_19 = arith.constant 0 : index
    %24 = vector.load %arg8[%c0_18, %c0_19] : memref<16x1xf32, #tpu.memory_space<vmem>>, vector<16x1xf32>
    %25 = vector.broadcast %24 : vector<16x1xf32> to vector<16x512xf32>
    %26 = arith.mulf %25, %23 : vector<16x512xf32>
    %cst_20 = arith.constant dense<0.000000e+00> : vector<512xf32>
    %27 = vector.multi_reduction <add>, %26, %cst_20 [0] : vector<16x512xf32> to vector<512xf32>
    %28 = vector.shape_cast %27 : vector<512xf32> to vector<1x512xf32>
    %c0_21 = arith.constant 0 : index
    %c0_22 = arith.constant 0 : index
    %29 = vector.load %arg9[%c0_21, %c0_22] : memref<1x1xf32, #tpu.memory_space<vmem>>, vector<1x1xf32>
    %30 = vector.broadcast %29 : vector<1x1xf32> to vector<1x512xf32>
    %31 = arith.addf %28, %30 : vector<1x512xf32>
    %32 = arith.negf %31 : vector<1x512xf32>
    %33 = math.exp %32 : vector<1x512xf32>
    %cst_23 = arith.constant 1.000000e+00 : f32
    %34 = vector.broadcast %cst_23 : f32 to vector<1x512xf32>
    %35 = arith.addf %34, %33 : vector<1x512xf32>
    %36 = arith.divf %34, %35 : vector<1x512xf32>
    %c0_24 = arith.constant 0 : index
    %c0_25 = arith.constant 0 : index
    %37 = vector.load %arg10[%c0_24, %c0_25] : memref<1x512xf32, #tpu.memory_space<vmem>>, vector<1x512xf32>
    tpu.vector_store %arg10[%c0_24, %c0_25], %36 {strides = array<i32>} : memref<1x512xf32, #tpu.memory_space<vmem>>, vector<1x512xf32>,
    return
  }
  func.func @transform_0(%arg0: i32) -> (i32, i32) {
    %c0_i32 = arith.constant 0 : i32
    %c0_i32_0 = arith.constant 0 : i32
    return %c0_i32, %arg0 : i32, i32
  }
  func.func @transform_1(%arg0: i32) -> (i32, i32) {
    %c0_i32 = arith.constant 0 : i32
    %c0_i32_0 = arith.constant 0 : i32
    %c0_i32_1 = arith.constant 0 : i32
    return %c0_i32, %c0_i32_0 : i32, i32
  }
  func.func @transform_2(%arg0: i32) -> (i32, i32) {
    %c0_i32 = arith.constant 0 : i32
    %c0_i32_0 = arith.constant 0 : i32
    %c0_i32_1 = arith.constant 0 : i32
    return %c0_i32, %c0_i32_0 : i32, i32
  }
  func.func @transform_3(%arg0: i32) -> (i32, i32) {
    %c0_i32 = arith.constant 0 : i32
    %c0_i32_0 = arith.constant 0 : i32
    %c0_i32_1 = arith.constant 0 : i32
    return %c0_i32, %c0_i32_0 : i32, i32
  }
  func.func @transform_4(%arg0: i32) -> (i32, i32) {
    %c0_i32 = arith.constant 0 : i32
    %c0_i32_0 = arith.constant 0 : i32
    %c0_i32_1 = arith.constant 0 : i32
    return %c0_i32, %c0_i32_0 : i32, i32
  }
  func.func @transform_5(%arg0: i32) -> (i32, i32) {
    %c0_i32 = arith.constant 0 : i32
    %c0_i32_0 = arith.constant 0 : i32
    %c0_i32_1 = arith.constant 0 : i32
    return %c0_i32, %c0_i32_0 : i32, i32
  }
  func.func @transform_6(%arg0: i32) -> (i32, i32) {
    %c0_i32 = arith.constant 0 : i32
    %c0_i32_0 = arith.constant 0 : i32
    %c0_i32_1 = arith.constant 0 : i32
    return %c0_i32, %c0_i32_0 : i32, i32
  }
  func.func @transform_7(%arg0: i32) -> (i32, i32) {
    %c0_i32 = arith.constant 0 : i32
    %c0_i32_0 = arith.constant 0 : i32
    %c0_i32_1 = arith.constant 0 : i32
    return %c0_i32, %c0_i32_0 : i32, i32
  }
  func.func @transform_8(%arg0: i32) -> (i32, i32) {
    %c0_i32 = arith.constant 0 : i32
    %c0_i32_0 = arith.constant 0 : i32
    %c0_i32_1 = arith.constant 0 : i32
    return %c0_i32, %c0_i32_0 : i32, i32
  }
  func.func @transform_9(%arg0: i32) -> (i32, i32) {
    %c0_i32 = arith.constant 0 : i32
    %c0_i32_0 = arith.constant 0 : i32
    return %c0_i32, %arg0 : i32, i32
  }
}

</mosaic_0001>

<bundles_post_ra>
// kernel: tpu_custom_call.1
= control target key start
LH: loop header
LB: loop body
LE: loop exit
PB: predicated region body
PF: predicated region fallthrough
CT: control target
= control target key end

     0   :  { %s1092_s0 = inlined_call_operand.vmem [shape: bf16[16,512], index: 0, kind: input, shape index: {}]   ;;  %s1093_s1 = inlined_call_operand.vmem [shape: bf16[64,16], index: 1, kind: input, shape index: {}]   ;;  %s1094_s2 = inlined_call_operand.vmem [shape: f32[64,1], index: 2, kind: input, shape index: {}]   ;;  %s1095_s3 = inlined_call_operand.vmem [shape: bf16[32,64], index: 3, kind: input, shape index: {}]   ;;  %s1096_s4 = inlined_call_operand.vmem [shape: f32[32,1], index: 4, kind: input, shape index: {}]   ;;  %s1097_s5 = inlined_call_operand.vmem [shape: bf16[16,32], index: 5, kind: input, shape index: {}]   ;;  %s1098_s6 = inlined_call_operand.vmem [shape: f32[16,1], index: 6, kind: input, shape index: {}]   ;;  %s1099_s7 = inlined_call_operand.vmem [shape: f32[16,1], index: 7, kind: input, shape index: {}]   ;;  %s1100_s8 = inlined_call_operand.<no memory space> [shape: f32[1,1], index: 8, kind: input, shape index: {}]   ;;  %s1101_s9 = inlined_call_operand.hbm [shape: f32[1,512], index: 9, kind: output, shape index: {}]  }
   0x1   :  { %v14_v0 = vstv %s1100_s8 }
   0x2   :  { %15 = vst [vmem:[#allocation2] sm:$0x1] %v14_v0 }
   0x3   :  { %v803_v1 = vld [vmem:[%s1092_s0 + $0x4] ss:$16 sps:$4 sm:$0xff]   ;;  %v805_v2 = vld [vmem:[%s1092_s0 + $0xc] ss:$16 sps:$4 sm:$0xff]   ;;  %v854_v3 = vmov 0   ;;  %vm136_vm0 = vcmask 130048  }
   0x4   :  { %181 = vmatprep.mubr.bf16.mxu0 %v854_v3  ;;  %254 = vmatprep.mubr.bf16.mxu1 %v854_v3  ;;  %v807_v4 = vld [vmem:[%s1092_s0] ss:$16 sps:$4 sm:$0xff]   ;;  %v808_v5 = vld [vmem:[%s1092_s0 + $0x8] ss:$16 sps:$4 sm:$0xff]  }
   0x5   :  { %163 = vmatprep.subr.bf16.mxu0 %v803_v1  ;;  %801 = vset.pattern.permute.xlu0 %v854_v3  ;;  %v809_v6 = vld [vmem:[%s1093_s1] sm:$0xff]   ;;  %v54_v7 = vld [vmem:[%s1094_s2 + $0x30] sm:$0xff]  ;;  %v55_v9 = vld [vmem:[%s1094_s2 + $0x38] sm:$0xff] }
   0x6   :  { %236 = vmatprep.subr.bf16.mxu1 %v805_v2  ;;  %802 = vset.pattern.permute.xlu1 %v854_v3  ;;  %v52_v8 = vld [vmem:[%s1094_s2 + $0x20] sm:$0xff]  ;;  %v53_v10 = vld [vmem:[%s1094_s2 + $0x28] sm:$0xff]  ;;  %v50_v12 = vld [vmem:[%s1094_s2 + $0x10] sm:$0xff] }
   0x7   :  { %164 = vmatpush1.bf16.msra.mxu0 %v807_v4  ;;  %237 = vmatpush1.bf16.msra.mxu1 %v808_v5  ;;  %v810_v11 = vld [vmem:[%s1093_s1 + $0x8] sm:$0xff]   ;;  %v51_v13 = vld [vmem:[%s1094_s2 + $0x18] sm:$0xff] }
   0x8   :  { %88 = vperm.xlu0 %801, %v54_v7   ;;  %78 = vperm.xlu1 %802, %v52_v8  }
   0xa   :  { %777 = vmatmul.mubr.msk.bf16.vlgmr.msra.gmra.mxu0 %vm136_vm0, %v809_v6  ;;  %781 = vmatmul.mubr.msk.bf16.vlgmr.msra.gmra.mxu1 %vm136_vm0, %v809_v6 }
   0xb   :  { %191 = vmatprep.mubr.bf16.mxu0 %v854_v3  ;;  %264 = vmatprep.mubr.bf16.mxu1 %v854_v3 }
   0xc   :  { %93 = vperm.xlu0 %801, %v55_v9   ;;  %83 = vperm.xlu1 %802, %v53_v10  }
   0xd   :  { %16 = vsyncpa [#allocation4], 0  ;;  %v48_v14 = vld [vmem:[%s1094_s2] sm:$0xff]  ;;  %v49_v15 = vld [vmem:[%s1094_s2 + $0x8] sm:$0xff]  ;;  %vm381_vm1 = vcmask 523264   ;;  %vm537_vm2 = vcmask 261120  }
   0xe   :  { %v811_v16 = vld [vmem:[%s1093_s1 + $0x10] sm:$0xff]   ;;  %v350_v18 = vld [vmem:[%s1096_s4 + $0x18] sm:$0xff]  ;;  %v347_v19 = vld [vmem:[%s1096_s4] sm:$0xff] }
   0xf   :  { %v349_v17 = vld [vmem:[%s1096_s4 + $0x10] sm:$0xff]  ;;  %v348_v20 = vld [vmem:[%s1096_s4 + $0x8] sm:$0xff]  ;;  %v812_v21 = vld [vmem:[%s1093_s1 + $0x18] sm:$0xff]  }
  0x10   :  { %68 = vperm.xlu0 %801, %v50_v12   ;;  %73 = vperm.xlu1 %802, %v51_v13   ;;  %v520_v22 = vld [vmem:[%s1098_s6] sm:$0xff]  ;;  %v521_v23 = vld [vmem:[%s1098_s6 + $0x8] sm:$0xff] }
  0x11   :  { %v635_v24 = vld [vmem:[%s1099_s7] sm:$0xff]  ;;  %v636_v25 = vld [vmem:[%s1099_s7 + $0x8] sm:$0xff] }
  0x12   :  { %778 = vmatmul.mubr.msk.bf16.gmra.mxu0 %vm136_vm0, %v810_v11  ;;  %782 = vmatmul.mubr.msk.bf16.gmra.mxu1 %vm136_vm0, %v810_v11  ;;  %v683_v26 = vld [vmem:[#allocation2] sm:$0x1] }
  0x13   :  { %201 = vmatprep.mubr.bf16.mxu0 %v854_v3  ;;  %274 = vmatprep.mubr.bf16.mxu1 %v854_v3 }
  0x14   :  { %58 = vperm.xlu0 %801, %v48_v14   ;;  %63 = vperm.xlu1 %802, %v49_v15  }
  0x18   :  { %363 = vperm.xlu0 %801, %v349_v17   ;;  %368 = vperm.xlu1 %802, %v350_v18  }
  0x1a   :  { %779 = vmatmul.mubr.msk.bf16.gmra.mxu0 %vm136_vm0, %v811_v16  ;;  %783 = vmatmul.mubr.msk.bf16.gmra.mxu1 %vm136_vm0, %v811_v16 }
  0x1b   :  { %211 = vmatprep.mubr.bf16.mxu0 %v854_v3  ;;  %284 = vmatprep.mubr.bf16.mxu1 %v854_v3 }
  0x1c   :  { %353 = vperm.xlu0 %801, %v347_v19   ;;  %358 = vperm.xlu1 %802, %v348_v20  }
  0x20   :  { %524 = vperm.xlu0 %801, %v520_v22   ;;  %529 = vperm.xlu1 %802, %v521_v23  }
  0x22   :  { %780 = vmatmul.mubr.msk.bf16.gmra.mxu0 %vm136_vm0, %v812_v21  ;;  %784 = vmatmul.mubr.msk.bf16.gmra.mxu1 %vm136_vm0, %v812_v21 }
  0x23   :  { %420 = vmatprep.mubr.bf16.mxu0 %v854_v3  ;;  %473 = vmatprep.mubr.bf16.mxu1 %v854_v3 }
  0x24   :  { %639 = vperm.xlu0 %801, %v635_v24   ;;  %644 = vperm.xlu1 %802, %v636_v25  }
  0x28   :  { %686 = vperm.xlu0 %801, %v683_v26  }
  0x83   :  { %v89_v35 = vpop.permute.xlu0 %88  ;;  %v1010_v36 = vpop.permute.xlu1 %78 }
  0x87   :  { %v94_v43 = vpop.permute.xlu0 %93  ;;  %v84_v44 = vpop.permute.xlu1 %83 }
  0x8b   :  { %v1016_v51 = vpop.permute.xlu0 %68  ;;  %v74_v52 = vpop.permute.xlu1 %73 }
  0x8f   :  { %v1018_v59 = vpop.permute.xlu0 %58  ;;  %v1020_v60 = vpop.permute.xlu1 %63 }
  0xca   :  { %v1002_v27 = vpop.f32.mrf.mxu0  ;;  %v1004_v28 = vpop.f32.mrf.mxu1 }
  0xcc   :  { %v185_v29 = vpop.f32.mrf.mxu0  ;;  %v258_v30 = vpop.f32.mrf.mxu1 }
  0xcd   :  { %v1023_v61 = vadd.f32 %v185_v29, %v1018_v59  ;;  %v1026_v62 = vadd.f32 %v258_v30, %v1018_v59 }
  0xce   :  { %v1006_v31 = vpop.f32.mrf.mxu0  ;;  %v1008_v32 = vpop.f32.mrf.mxu1 }
  0xd0   :  { %v189_v33 = vpop.f32.mrf.mxu0  ;;  %v262_v34 = vpop.f32.mrf.mxu1 }
  0xd1   :  { %v1029_v63 = vadd.f32 %v189_v33, %v1020_v60  ;;  %v1032_v0 = vadd.f32 %v262_v34, %v1020_v60 }
  0xd2   :  { %v1012_v37 = vpop.f32.mrf.mxu0  ;;  %v1014_v38 = vpop.f32.mrf.mxu1 }
  0xd4   :  { %v195_v39 = vpop.f32.mrf.mxu0  ;;  %v268_v40 = vpop.f32.mrf.mxu1 }
  0xd5   :  { %v1035_v4 = vadd.f32 %v195_v39, %v1016_v51  ;;  %v1038_v5 = vadd.f32 %v268_v40, %v1016_v51 }
  0xd6   :  { %v197_v41 = vpop.f32.mrf.mxu0  ;;  %v270_v42 = vpop.f32.mrf.mxu1 }
  0xd7   :  { %v1040_v6 = vadd.f32 %v197_v41, %v74_v52  ;;  %v1042_v7 = vadd.f32 %v270_v42, %v74_v52 }
  0xd8   :  { %v199_v45 = vpop.f32.mrf.mxu0  ;;  %v272_v46 = vpop.f32.mrf.mxu1 }
  0xd9   :  { %v1044_v8 = vadd.f32 %v199_v45, %v74_v52  ;;  %v1046_v9 = vadd.f32 %v272_v46, %v74_v52 }
  0xda   :  { %v203_v47 = vpop.f32.mrf.mxu0  ;;  %v276_v48 = vpop.f32.mrf.mxu1 }
  0xdb   :  { %v204_v46 = vadd.f32 %v203_v47, %v1010_v36  ;;  %v267_v47 = vadd.f32 %v1014_v38, %v1016_v51  ;;  %v309_v38 = vmax.f32 %v1042_v7, 0.0  ;;  %v298_v7 = vmax.f32 %v1026_v62, 0.0  ;;  %v814_v62 = vld [vmem:[%s1095_s3 + $0x8] sm:$0xff]  }
  0xdc   :  { %v205_v49 = vpop.f32.mrf.mxu0  ;;  %v278_v50 = vpop.f32.mrf.mxu1 }
  0xdd   :  { %v206_v18 = vadd.f32 %v205_v49, %v1010_v36  ;;  %v279_v19 = vadd.f32 %v278_v50, %v1010_v36  ;;  %v277_v49 = vadd.f32 %v276_v48, %v1010_v36  ;;  %v194_v36 = vadd.f32 %v1012_v37, %v1016_v51 }
  0xde   :  { %v207_v53 = vpop.f32.mrf.mxu0  ;;  %v280_v54 = vpop.f32.mrf.mxu1  ;;  %v311_v48 = vmax.f32 %v204_v46, 0.0  ;;  %v307_v37 = vmax.f32 %v1040_v6, 0.0  ;;  %v296_v6 = vmax.f32 %v1023_v61, 0.0  ;;  %v813_v61 = vld [vmem:[%s1095_s3] sm:$0xff]  }
  0xdf   :  { %v208_v24 = vadd.f32 %v207_v53, %v84_v44  ;;  %v281_v25 = vadd.f32 %v280_v54, %v84_v44  ;;  %v312_v52 = vmax.f32 %v206_v18, 0.0 }
  0xe0   :  { %v209_v55 = vpop.f32.mrf.mxu0  ;;  %v282_v56 = vpop.f32.mrf.mxu1 }
  0xe1   :  { %v210_v10 = vadd.f32 %v209_v55, %v84_v44  ;;  %v283_v11 = vadd.f32 %v282_v56, %v84_v44  ;;  %v314_v55 = vmax.f32 %v279_v19, 0.0  ;;  %v315_v54 = vmax.f32 %v208_v24, 0.0 }
  0xe2   :  { %v213_v57 = vpop.f32.mrf.mxu0  ;;  %v286_v58 = vpop.f32.mrf.mxu1 }
  0xe3   :  { %v214_v20 = vadd.f32 %v213_v57, %v89_v35  ;;  %v287_v21 = vadd.f32 %v286_v58, %v89_v35  ;;  %v316_v30 = vmax.f32 %v210_v10, 0.0  ;;  %v318_v33 = vmax.f32 %v283_v11, 0.0 }
  0xe4   :  { %v215_v1 = vpop.f32.mrf.mxu0  ;;  %v288_v2 = vpop.f32.mrf.mxu1  ;;  %v308_v58 = vmax.f32 %v1044_v8, 0.0  ;;  %v313_v11 = vmax.f32 %v277_v49, 0.0  ;;  %v261_v8 = vadd.f32 %v1008_v32, %v1020_v60  ;;  %v339_v51 = vpack.c.bf16 %v315_v54, %v311_v48 }
  0xe5   :  { %v216_v14 = vadd.f32 %v215_v1, %v89_v35  ;;  %v289_v15 = vadd.f32 %v288_v2, %v89_v35  ;;  %v319_v50 = vmax.f32 %v214_v20, 0.0  ;;  %v321_v35 = vmax.f32 %v287_v21, 0.0 }
  0xe6   :  { %v217_v12 = vpop.f32.mrf.mxu0  ;;  %v290_v13 = vpop.f32.mrf.mxu1  ;;  %v310_v1 = vmax.f32 %v1046_v9, 0.0  ;;  %v340_v2 = vpack.c.bf16 %v316_v30, %v312_v52  ;;  %v342_v10 = vpack.c.bf16 %v318_v33, %v314_v55  ;;  %v304_v9 = vmax.f32 %v1035_v4, 0.0 }
  0xe7   :  { %v218_v16 = vadd.f32 %v217_v12, %v94_v43  ;;  %v291_v17 = vadd.f32 %v290_v13, %v94_v43  ;;  %v320_v40 = vmax.f32 %v216_v14, 0.0  ;;  %v322_v41 = vmax.f32 %v289_v15, 0.0  ;;  %v369_v33 = vpop.permute.xlu1 %368 }
  0xe8   :  { %v219_v22 = vpop.f32.mrf.mxu0  ;;  %v292_v23 = vpop.f32.mrf.mxu1  ;;  %v188_v12 = vadd.f32 %v1006_v31, %v1020_v60  ;;  %v306_v13 = vmax.f32 %v1038_v5, 0.0  ;;  %v300_v15 = vmax.f32 %v1029_v63, 0.0  ;;  %v336_v31 = vpack.c.bf16 %v308_v58, %v304_v9 }
  0xe9   :  { %v220_v26 = vadd.f32 %v219_v22, %v94_v43  ;;  %v293_v29 = vadd.f32 %v292_v23, %v94_v43  ;;  %v323_v34 = vmax.f32 %v218_v16, 0.0  ;;  %v325_v39 = vmax.f32 %v291_v17, 0.0 }
  0xea   :  { %v317_v43 = vmax.f32 %v281_v25, 0.0  ;;  %v302_v16 = vmax.f32 %v1032_v0, 0.0  ;;  %v338_v17 = vpack.c.bf16 %v310_v1, %v306_v13  ;;  %v184_v32 = vadd.f32 %v1002_v27, %v1018_v59 }
  0xeb   :  { %v324_v42 = vmax.f32 %v220_v26, 0.0  ;;  %v326_v45 = vmax.f32 %v293_v29, 0.0  ;;  %v343_v56 = vpack.c.bf16 %v323_v34, %v319_v50  ;;  %v345_v57 = vpack.c.bf16 %v325_v39, %v321_v35  ;;  %v359_v49 = vpop.permute.xlu1 %358 }
  0xec   :  { %v341_v14 = vpack.c.bf16 %v317_v43, %v313_v11  ;;  %v257_v60 = vadd.f32 %v1004_v28, %v1018_v59  ;;  %v303_v4 = vmax.f32 %v194_v36, 0.0  ;;  %v305_v5 = vmax.f32 %v267_v47, 0.0 }
  0xed   :  { %v344_v53 = vpack.c.bf16 %v324_v42, %v320_v40  ;;  %v346_v44 = vpack.c.bf16 %v326_v45, %v322_v41  ;;  %v299_v63 = vmax.f32 %v188_v12, 0.0  ;;  %v301_v0 = vmax.f32 %v261_v8, 0.0  ;;  %v364_v40 = vpop.permute.xlu0 %363 }
  0xee   :  { %v335_v18 = vpack.c.bf16 %v307_v37, %v303_v4  ;;  %v337_v19 = vpack.c.bf16 %v309_v38, %v305_v5  ;;  %v332_v20 = vpack.c.bf16 %v300_v15, %v296_v6  ;;  %v334_v21 = vpack.c.bf16 %v302_v16, %v298_v7 }
  0xef   :  { %396 = vmatprep.subr.bf16.mxu0 %v344_v53  ;;  %449 = vmatprep.subr.bf16.mxu1 %v346_v44  ;;  %v295_v27 = vmax.f32 %v184_v32, 0.0  ;;  %v297_v22 = vmax.f32 %v257_v60, 0.0 }
  0xf0   :  { %397 = vmatpush1.bf16.msra.mxu0 %v343_v56  ;;  %450 = vmatpush1.bf16.msra.mxu1 %v345_v57 }
  0xf1   :  { %398 = vmatprep.subr.bf16.mxu0 %v340_v2  ;;  %451 = vmatprep.subr.bf16.mxu1 %v342_v10  ;;  %v331_v28 = vpack.c.bf16 %v299_v63, %v295_v27  ;;  %v333_v59 = vpack.c.bf16 %v301_v0, %v297_v22 }
  0xf4   :  { %399 = vmatpush1.bf16.msra.mxu0 %v339_v51  ;;  %452 = vmatpush1.bf16.msra.mxu1 %v341_v14 }
  0xf5   :  { %400 = vmatprep.subr.bf16.mxu0 %v336_v31  ;;  %453 = vmatprep.subr.bf16.mxu1 %v338_v17 }
  0xf8   :  { %401 = vmatpush1.bf16.msra.mxu0 %v335_v18  ;;  %454 = vmatpush1.bf16.msra.mxu1 %v337_v19 }
  0xf9   :  { %402 = vmatprep.subr.bf16.mxu0 %v332_v20  ;;  %455 = vmatprep.subr.bf16.mxu1 %v334_v21 }
  0xfc   :  { %403 = vmatpush1.bf16.msra.mxu0 %v331_v28  ;;  %456 = vmatpush1.bf16.msra.mxu1 %v333_v59  ;;  %v815_v28 = vld [vmem:[%s1097_s5] sm:$0xff]   ;;  %s856_s5 = smov [#allocation3]  }
  0xfd   :  { %s761_s13 = sshll.u32 %s856_s5, 4  ;;  %s762_s13 = int_to_ptr.vmem [resolvable:$true] %s761_s13 }
  0xfe   :  { %s832_s14 = scalar_lea.vmem %s762_s13, 64  ;;  %p837_p1 = scmp.lt.s32.totalorder %s762_s13, %s762_s13 }
  0xff   :  { %787 = vmatmul.mubr.msk.bf16.vlgmr.msra.gmra.mxu0 %vm381_vm1, %v813_v61  ;;  %789 = vmatmul.mubr.msk.bf16.vlgmr.msra.gmra.mxu1 %vm381_vm1, %v813_v61  ;;  %p833_p0 = scmp.ne.s32.totalorder %s762_s13, %s832_s14  ;;  %p838_p2 = scmp.lt.s32.totalorder %s832_s14, %s832_s14 }
 0x100   :  { %430 = vmatprep.mubr.bf16.mxu0 %v854_v3  ;;  %483 = vmatprep.mubr.bf16.mxu1 %v854_v3 }
 0x101   :  { %p839_p3 = por %p838_p2, %p837_p1 }
 0x103   :  { %p840_p4 = pnand %p839_p3, %p833_p0 }
 0x107   :  { %788 = vmatmul.mubr.msk.bf16.gmra.mxu0 %vm381_vm1, %v814_v62  ;;  %790 = vmatmul.mubr.msk.bf16.gmra.mxu1 %vm381_vm1, %v814_v62 }
 0x108   :  { %573 = vmatprep.mubr.bf16.mxu0 %v854_v3  ;;  %616 = vmatprep.mubr.bf16.mxu1 %v854_v3  ;;  %v354_v3 = vpop.permute.xlu0 %353 }
 0x10c   :  { %v525_v62 = vpop.permute.xlu0 %524 }
 0x1bf   :  { %v422_v23 = vpop.f32.mrf.mxu0  ;;  %v475_v24 = vpop.f32.mrf.mxu1 }
 0x1c0   :  { %v423_v15 = vadd.f32 %v422_v23, %v354_v3  ;;  %v476_v16 = vadd.f32 %v475_v24, %v354_v3 }
 0x1c1   :  { %v424_v25 = vpop.f32.mrf.mxu0  ;;  %v477_v26 = vpop.f32.mrf.mxu1 }
 0x1c2   :  { %v425_v56 = vadd.f32 %v424_v25, %v354_v3  ;;  %v478_v57 = vadd.f32 %v477_v26, %v354_v3  ;;  %v494_v20 = vmax.f32 %v423_v15, 0.0  ;;  %v496_v21 = vmax.f32 %v476_v16, 0.0 }
 0x1c3   :  { %v426_v29 = vpop.f32.mrf.mxu0  ;;  %v479_v30 = vpop.f32.mrf.mxu1 }
 0x1c4   :  { %v427_v36 = vadd.f32 %v426_v29, %v359_v49  ;;  %v480_v47 = vadd.f32 %v479_v30, %v359_v49  ;;  %v495_v32 = vmax.f32 %v425_v56, 0.0  ;;  %v497_v60 = vmax.f32 %v478_v57, 0.0  ;;  %v530_v29 = vpop.permute.xlu1 %529 }
 0x1c5   :  { %v428_v34 = vpop.f32.mrf.mxu0  ;;  %v481_v39 = vpop.f32.mrf.mxu1 }
 0x1c6   :  { %v429_v50 = vadd.f32 %v428_v34, %v359_v49  ;;  %v482_v35 = vadd.f32 %v481_v39, %v359_v49  ;;  %v498_v6 = vmax.f32 %v427_v36, 0.0  ;;  %v500_v7 = vmax.f32 %v480_v47, 0.0 }
 0x1c7   :  { %v432_v41 = vpop.f32.mrf.mxu0  ;;  %v485_v42 = vpop.f32.mrf.mxu1 }
 0x1c8   :  { %v433_v58 = vadd.f32 %v432_v41, %v364_v40  ;;  %v486_v1 = vadd.f32 %v485_v42, %v364_v40  ;;  %v499_v12 = vmax.f32 %v429_v50, 0.0  ;;  %v501_v8 = vmax.f32 %v482_v35, 0.0 }
 0x1c9   :  { %v434_v45 = vpop.f32.mrf.mxu0  ;;  %v487_v46 = vpop.f32.mrf.mxu1  ;;  %v512_v27 = vpack.c.bf16 %v498_v6, %v494_v20  ;;  %v514_v22 = vpack.c.bf16 %v500_v7, %v496_v21 }
 0x1ca   :  { %v435_v53 = vadd.f32 %v434_v45, %v364_v40  ;;  %v488_v44 = vadd.f32 %v487_v46, %v364_v40  ;;  %v502_v31 = vmax.f32 %v433_v58, 0.0  ;;  %v504_v17 = vmax.f32 %v486_v1, 0.0 }
 0x1cb   :  { %v436_v52 = vpop.f32.mrf.mxu0  ;;  %v489_v55 = vpop.f32.mrf.mxu1  ;;  %v513_v18 = vpack.c.bf16 %v499_v12, %v495_v32  ;;  %v515_v19 = vpack.c.bf16 %v501_v8, %v497_v60 }
 0x1cc   :  { %v437_v54 = vadd.f32 %v436_v52, %v369_v33  ;;  %v490_v43 = vadd.f32 %v489_v55, %v369_v33  ;;  %v503_v37 = vmax.f32 %v435_v53, 0.0  ;;  %v505_v38 = vmax.f32 %v488_v44, 0.0  ;;  %v640_v44 = vpop.permute.xlu0 %639 }
 0x1cd   :  { %v438_v2 = vpop.f32.mrf.mxu0  ;;  %v491_v10 = vpop.f32.mrf.mxu1 }
 0x1ce   :  { %v439_v48 = vadd.f32 %v438_v2, %v369_v33  ;;  %v492_v11 = vadd.f32 %v491_v10, %v369_v33  ;;  %v506_v9 = vmax.f32 %v437_v54, 0.0  ;;  %v508_v13 = vmax.f32 %v490_v43, 0.0  ;;  %v645_v54 = vpop.permute.xlu1 %644 }
 0x1d0   :  { %v507_v51 = vmax.f32 %v439_v48, 0.0  ;;  %v509_v14 = vmax.f32 %v492_v11, 0.0  ;;  %v516_v63 = vpack.c.bf16 %v506_v9, %v502_v31  ;;  %v518_v0 = vpack.c.bf16 %v508_v13, %v504_v17 }
 0x1d1   :  { %v689_v11 = vlaneseq }
 0x1d2   :  { %v517_v4 = vpack.c.bf16 %v507_v51, %v503_v37  ;;  %v519_v5 = vpack.c.bf16 %v509_v14, %v505_v38 }
 0x1d3   :  { %v690_v15 = vshrl.u32 %v689_v11, 7  ;;  %vm752_vm3 = vcmp.lt.s32.totalorder %v689_v11, 512 }
 0x1d4   :  { %553 = vmatprep.subr.bf16.mxu0 %v517_v4  ;;  %596 = vmatprep.subr.bf16.mxu1 %v519_v5 }
 0x1d5   :  { %554 = vmatpush1.bf16.msra.mxu0 %v516_v63  ;;  %597 = vmatpush1.bf16.msra.mxu1 %v518_v0  ;;  %v691_v7 = vsub.s32 0, %v690_v15 }
 0x1d6   :  { %555 = vmatprep.subr.bf16.mxu0 %v513_v18  ;;  %598 = vmatprep.subr.bf16.mxu1 %v515_v19  ;;  %v687_v18 = vpop.permute.xlu0 %686 }
 0x1d9   :  { %556 = vmatpush1.bf16.msra.mxu0 %v512_v27  ;;  %599 = vmatpush1.bf16.msra.mxu1 %v514_v22 }
 0x1dc   :  { %792 = vmatmul.mubr.msk.bf16.vlgmr.msra.gmra.mxu0 %vm537_vm2, %v815_v28  ;;  %793 = vmatmul.mubr.msk.bf16.vlgmr.msra.gmra.mxu1 %vm537_vm2, %v815_v28 }
 0x29c   :  { %v575_v59 = vpop.f32.mrf.mxu0  ;;  %v618_v61 = vpop.f32.mrf.mxu1 }
 0x29d   :  { %v576_v23 = vadd.f32 %v575_v59, %v525_v62  ;;  %v619_v24 = vadd.f32 %v618_v61, %v525_v62  ;;  %v692_v59 = vrot.slane %v687_v18, %v691_v7 }
 0x29e   :  { %v577_v25 = vpop.f32.mrf.mxu0  ;;  %v620_v26 = vpop.f32.mrf.mxu1 }
 0x29f   :  { %v578_v30 = vadd.f32 %v577_v25, %v525_v62  ;;  %v621_v33 = vadd.f32 %v620_v26, %v525_v62  ;;  %v627_v40 = vmax.f32 %v576_v23, 0.0  ;;  %v629_v41 = vmax.f32 %v619_v24, 0.0 }
 0x2a0   :  { %v579_v34 = vpop.f32.mrf.mxu0  ;;  %v622_v39 = vpop.f32.mrf.mxu1 }
 0x2a1   :  { %v580_v42 = vadd.f32 %v579_v34, %v530_v29  ;;  %v623_v45 = vadd.f32 %v622_v39, %v530_v29  ;;  %v628_v50 = vmax.f32 %v578_v30, 0.0  ;;  %v630_v35 = vmax.f32 %v621_v33, 0.0 }
 0x2a2   :  { %v581_v46 = vpop.f32.mrf.mxu0  ;;  %v624_v49 = vpop.f32.mrf.mxu1  ;;  %v647_v57 = vmul.f32 %v640_v44, %v627_v40  ;;  %v649_v58 = vmul.f32 %v640_v44, %v629_v41 }
 0x2a3   :  { %v582_v52 = vadd.f32 %v581_v46, %v530_v29  ;;  %v625_v55 = vadd.f32 %v624_v49, %v530_v29  ;;  %v631_v3 = vmax.f32 %v580_v42, 0.0  ;;  %v633_v53 = vmax.f32 %v623_v45, 0.0 }
 0x2a4   :  { %v648_v10 = vmul.f32 %v640_v44, %v628_v50  ;;  %v650_v36 = vmul.f32 %v640_v44, %v630_v35 }
 0x2a5   :  { %v632_v43 = vmax.f32 %v582_v52, 0.0  ;;  %v634_v56 = vmax.f32 %v625_v55, 0.0  ;;  %v651_v1 = vmul.f32 %v645_v54, %v631_v3  ;;  %v653_v2 = vmul.f32 %v645_v54, %v633_v53 }
 0x2a6   :  { %v855_v55 = vmov 1966171168  }
 0x2a7   :  { %v652_v47 = vmul.f32 %v645_v54, %v632_v43  ;;  %v654_v48 = vmul.f32 %v645_v54, %v634_v56  ;;  %v655_v12 = vadd.f32 %v651_v1, %v647_v57  ;;  %v669_v8 = vadd.f32 %v653_v2, %v649_v58 }
 0x2a8   :  { %v728_v3 = vunpack.c.l.s4 %v855_v55 }
 0x2a9   :  { %v662_v9 = vadd.f32 %v652_v47, %v648_v10  ;;  %v676_v13 = vadd.f32 %v654_v48, %v650_v36  ;;  %v656_v37 = vrot.slane %v655_v12, 4  ;;  %v670_v38 = vrot.slane %v669_v8, 4 }
 0x2aa   :  { %v729_v53 = vunpack.c.0.s8 %v728_v3 }
 0x2ab   :  { %v663_v51 = vrot.slane %v662_v9, 4  ;;  %v677_v14 = vrot.slane %v676_v13, 4  ;;  %v657_v16 = vadd.f32 %v656_v37, %v655_v12  ;;  %v671_v31 = vadd.f32 %v670_v38, %v669_v8 }
 0x2ac   :  { %v732_v43 = vsub.s32 %v729_v53, %v690_v15 }
 0x2ad   :  { %v664_v17 = vadd.f32 %v663_v51, %v662_v9  ;;  %v678_v32 = vadd.f32 %v677_v14, %v676_v13  ;;  %v658_v60 = vrot.slane %v657_v16, 2  ;;  %v672_v4 = vrot.slane %v671_v31, 2 }
 0x2af   :  { %v665_v5 = vrot.slane %v664_v17, 2  ;;  %v679_v6 = vrot.slane %v678_v32, 2  ;;  %v659_v63 = vadd.f32 %v658_v60, %v657_v16  ;;  %v673_v0 = vadd.f32 %v672_v4, %v671_v31 }
 0x2b1   :  { %v666_v19 = vadd.f32 %v665_v5, %v664_v17  ;;  %v680_v20 = vadd.f32 %v679_v6, %v678_v32  ;;  %v660_v21 = vrot.slane %v659_v63, 1  ;;  %v674_v27 = vrot.slane %v673_v0, 1 }
 0x2b3   :  { %v667_v22 = vrot.slane %v666_v19, 1  ;;  %v681_v28 = vrot.slane %v680_v20, 1  ;;  %v661_v61 = vadd.f32 %v660_v21, %v659_v63  ;;  %v675_v62 = vadd.f32 %v674_v27, %v673_v0 }
 0x2b5   :  { %v668_v23 = vadd.f32 %v667_v22, %v666_v19  ;;  %v682_v24 = vadd.f32 %v681_v28, %v680_v20  ;;  %v693_v25 = vadd.f32 %v692_v59, %v661_v61  ;;  %v695_v26 = vadd.f32 %v692_v59, %v675_v62 }
 0x2b7   :  { %v694_v29 = vadd.f32 %v692_v59, %v668_v23  ;;  %v696_v30 = vadd.f32 %v692_v59, %v682_v24  ;;  %v794_v33 = vmul.f32 -1.442695, %v693_v25  ;;  %v796_v34 = vmul.f32 -1.442695, %v695_v26 }
 0x2b9   :  { %v795_v39 = vmul.f32 -1.442695, %v694_v29  ;;  %v797_v40 = vmul.f32 -1.442695, %v696_v30  ;;  %816 = vpow2.f32 %v794_v33 }
 0x2ba   :  { %818 = vpow2.f32 %v796_v34 }
 0x2bb   :  { %820 = vpow2.f32 %v795_v39 }
 0x2bc   :  { %822 = vpow2.f32 %v797_v40 }
 0x2c6   :  { %v817_v41 = vpop.eup %816 }
 0x2c7   :  { %v819_v42 = vpop.eup %818  ;;  %v709_v45 = vadd.f32 1.0, %v817_v41 }
 0x2c8   :  { %v821_v46 = vpop.eup %820  ;;  %v711_v49 = vadd.f32 1.0, %v819_v42 }
 0x2c9   :  { %v823_v50 = vpop.eup %822  ;;  %824 = vrcp.f32 %v709_v45  ;;  %v710_v35 = vadd.f32 1.0, %v821_v46 }
 0x2ca   :  { %826 = vrcp.f32 %v711_v49  ;;  %v712_v52 = vadd.f32 1.0, %v823_v50 }
 0x2cb   :  { %828 = vrcp.f32 %v710_v35 }
 0x2cc   :  { %830 = vrcp.f32 %v712_v52 }
 0x2d6   :  { %v825_v44 = vpop.eup %824 }
 0x2d7   :  { %v827_v54 = vpop.eup %826 }
 0x2d8   :  { %v829_v56 = vpop.eup %828 }
 0x2d9   :  { %v831_v57 = vpop.eup %830  ;;  %v725_v58 = vcombine.low %v825_v44, %v829_v56 }
 0x2da   :  { %v726_v1 = vcombine.low %v827_v54, %v831_v57 }
 0x2db   :  { %v733_v2 = vrot.slane %v725_v58, %v732_v43 }
 0x2dc   :  { %v740_v10 = vrot.slane %v726_v1, %v732_v43 }
 0x2de   :  { %v741_v36 = vcombine.low %v733_v2, %v740_v10 }
 0x2e0   :  { %v748_v47 = vrot.slane %v741_v36, %v732_v43 }
 0x2e2   :  { %754 = vst.msk [vmem:[#allocation3] sm:$0xf] %vm752_vm3, %v748_v47 }
 0x2e3   :  { %843 = shalt.err (!%p840_p4)
}
 0x2e4   :  { %764 = dma.vmem_to_hbm [thread:$0]  %s762_s13, 64, %s1101_s9, [#allocation4]  }
 0x2e5   :  { %852 = dma.done.wait [#allocation4], 64  }
 0x2e6   :  { %853 = vsyncadd [#allocation4], 4294967232 }
 0x2e7   :  { %768 = vsyncpa [#allocation4], 1 }

</bundles_post_ra>
